<compile_context>
chip_gen: v7x
topology: tpu7x:2x2x1
jax: 0.10.0
libtpu: 0.0.40
codegen_flags: <defaults>
</compile_context>

<pallas_src>
import math

import jax
import jax.numpy as jnp
from jax.experimental import pallas as pl
from jax.experimental.pallas import tpu as pltpu


def _round_up(x, m):
    return (x + m - 1) // m * m


def _vmem_capacity_bytes():
    # Generation-aware VMEM capacity (v5e/v6e: 128 MiB, v7x: 64 MiB per core).
    try:
        return int(pltpu.get_tpu_info().vmem_capacity_bytes)
    except Exception:
        return 64 * 1024 * 1024  # conservative fallback, safe on every chip


def _biaffine_kernel(x1_ref, x2t_ref, w_ref, o_ref, lin_ref):
    # x1_ref : (1, n1_t, d1p_p)        compute dtype (bf16)
    # x2t_ref: (1, d2p_p, n2_t)        compute dtype
    # w_ref  : (d1p_p, o_t * d2p_p)    compute dtype (block index constant in n1/n2)
    # o_ref  : (1, o_t, n1_t, n2_t)    output dtype
    # lin_ref: (o_t * n1_t, d2p_p)     scratch: feature-major slabs of x1 @ W_k
    o_t, n1_t, n2_t = o_ref.shape[1], o_ref.shape[2], o_ref.shape[3]
    d2p_p = x2t_ref.shape[1]

    # GEMM-1: recomputed only when the (batch, O-tile, n1-tile) changes.
    # CORRECTNESS INVARIANT: the n2 axis (program_id(3)) must be the LAST,
    # sequentially iterated ("arbitrary") grid axis, otherwise lin_ref is stale.
    # Per-feature chunking avoids materializing a full f32 (n1_t, o_t*d2p_p) temp.
    @pl.when(pl.program_id(3) == 0)
    def _():
        x1 = x1_ref[0]                                     # (n1_t, d1p_p)
        for k in range(o_t):                               # amortized over the n2 sweep
            wk = w_ref[:, k * d2p_p:(k + 1) * d2p_p]       # 128-aligned lane slice
            lin_ref[k * n1_t:(k + 1) * n1_t, :] = jnp.dot(
                x1, wk, preferred_element_type=jnp.float32
            ).astype(lin_ref.dtype)

    # GEMM-2: one stacked large-M MXU call covering all o_t features.
    acc = jnp.dot(lin_ref[...], x2t_ref[0],
                  preferred_element_type=jnp.float32)      # (o_t*n1_t, n2_t) f32
    o_ref[0] = acc.reshape(o_t, n1_t, n2_t).astype(o_ref.dtype)


def biaffine_forward(x1, x2, weight, out_features, bias=(False, False), *,
                     compute_dtype=jnp.bfloat16, out_dtype=jnp.bfloat16,
                     n1_tile=512, n2_tile=512, o_tile=None,
                     transpose_output=True):
    """Matches Biaffine.forward.

    x1: (b, n1, d1), x2: (b, n2, d2),
    weight: (d1 + bias[0], (d2 + bias[1]) * out_features)
    returns (b, n1, n2, O)  (PyTorch layout), or the kernel-native
    (b, O, n1, n2) if transpose_output=False (avoids a full-output HBM
    read+write; prefer it when the consumer can take that layout).

    out_dtype defaults to bf16 (the MXU compute path is bf16 anyway); pass
    jnp.float32 to keep a full-width output.
    """
    b, n1, d1 = x1.shape
    b2, n2, d2 = x2.shape
    assert b == b2
    o = int(out_features)
    out_dtype = jnp.dtype(out_dtype)
    csz = jnp.dtype(compute_dtype).itemsize
    out_isz = out_dtype.itemsize

    d1p = d1 + int(bias[0])
    d2p = d2 + int(bias[1])
    assert weight.shape == (d1p, d2p * o), weight.shape

    # bias columns (same as torch.cat([x, ones], -1))
    if bias[0]:
        x1 = jnp.concatenate([x1, jnp.ones((b, n1, 1), x1.dtype)], axis=-1)
    if bias[1]:
        x2 = jnp.concatenate([x2, jnp.ones((b, n2, 1), x2.dtype)], axis=-1)

    # ---- alignment ----------------------------------------------------------
    d1p_p = _round_up(d1p, 128)      # lane-dense x1 tiles; pad is free MXU time
    d2p_p = _round_up(d2p, 128)      # lane-aligned per-feature group width

    # ---- tile selection from the actual chip's VMEM --------------------------
    vmem_cap = _vmem_capacity_bytes()
    budget = int(0.70 * vmem_cap)    # leave headroom for Mosaic internal scratch

    # n2 tile: lane-dense (multiple of 128); keep large (default 512) so stores
    # stay unmasked and per-step overhead is amortized (v5e has one vst slot).
    n2_t = max(128, min(_round_up(n2_tile, 128), _round_up(n2, 128)))
    n2_p = _round_up(n2, n2_t)

    # O tile: largest divisor of O whose (double-buffered) weight block fits in
    # ~45% of the budget -- bounds resident-weight VMEM on v7x (64 MiB).
    # TODO(synk): single-buffer the constant-index weight block via
    # pipeline_mode=pl.Buffered(1) once validated; it would halve this term.
    max_ot = o if o_tile is None else max(1, min(o, int(o_tile)))
    w_budget = int(0.45 * budget)
    o_t = 1
    for cand in range(1, max_ot + 1):
        if o % cand == 0 and 2 * d1p_p * cand * d2p_p * csz <= w_budget:
            o_t = cand
    w_blk = d1p_p * o_t * d2p_p * csz

    # n1 tile: from the remaining budget (double-buffered x1/out blocks, the lin
    # scratch, and the in-kernel f32 GEMM temporaries are all accounted for).
    fixed = 2 * w_blk + 2 * d2p_p * n2_t * csz
    per_n1 = (2 * d1p_p * csz              # x1 block (double-buffered)
              + o_t * d2p_p * csz          # lin scratch
              + 2 * o_t * n2_t * out_isz   # output block (double-buffered)
              + o_t * n2_t * 4             # GEMM-2 f32 accumulator temp
              + d2p_p * 4)                 # GEMM-1 per-feature f32 temp
    n1_cap = max(16, (budget - fixed) // max(1, per_n1))
    n1_t = min(n1_cap, max(16, n1_tile), _round_up(n1, 16))
    n1_t = max(16, n1_t // 16 * 16)        # multiple of 16: free bf16 reshapes
    n1_p = _round_up(n1, n1_t)

    # ---- operand preparation (cheap relative to the main GEMMs) --------------
    x1p = jnp.pad(x1, ((0, 0), (0, n1_p - n1), (0, d1p_p - d1p)))
    x1p = x1p.astype(compute_dtype)                              # (b, n1_p, d1p_p)
    x2p = jnp.pad(x2, ((0, 0), (0, n2_p - n2), (0, d2p_p - d2p)))
    x2t = jnp.transpose(x2p, (0, 2, 1)).astype(compute_dtype)    # (b, d2p_p, n2_p)

    # weight (d1p, O*d2p): zero-pad each d2p feature group to d2p_p, keep the
    # feature-major column grouping (no transpose of the weight).
    w3 = weight.reshape(d1p, o, d2p)
    w3 = jnp.pad(w3, ((0, d1p_p - d1p), (0, 0), (0, d2p_p - d2p)))
    w2 = w3.reshape(d1p_p, o * d2p_p).astype(compute_dtype)      # (d1p_p, O*d2p_p)

    grid = (b, o // o_t, n1_p // n1_t, n2_p // n2_t)

    # ---- VMEM limit & scheduler hint -----------------------------------------
    vmem_need = fixed + per_n1 * n1_t
    vmem_limit = int(min(0.75 * vmem_cap,
                         max(32 * 1024 * 1024, vmem_need + 8 * 1024 * 1024)))

    flops = 2 * b * o * n1_p * d1p_p * d2p_p + 2 * b * o * n1_p * d2p_p * n2_p
    bytes_accessed = (b * n1_p * d1p_p * csz * (o // o_t)
                      + b * d2p_p * n2_p * csz * (o // o_t) * (n1_p // n1_t)
                      + w2.size * csz
                      + b * o * n1_p * n2_p * out_isz)

    # Scratch-reuse invariant (see kernel): the n2 axis is the LAST grid axis
    # and is iterated sequentially ("arbitrary"); the outer axes may be sharded
    # across cores because each core still runs complete n2 sweeps.
    dim_sem = ("parallel", "parallel", "parallel", "arbitrary")
    assert len(dim_sem) == len(grid) and dim_sem[-1] == "arbitrary"

    out = pl.pallas_call(
        _biaffine_kernel,
        out_shape=jax.ShapeDtypeStruct((b, o, n1_p, n2_p), out_dtype),
        grid_spec=pltpu.PrefetchScalarGridSpec(
            num_scalar_prefetch=0,
            grid=grid,
            in_specs=[
                pl.BlockSpec((1, n1_t, d1p_p), lambda bi, oi, i, j: (bi, i, 0)),
                pl.BlockSpec((1, d2p_p, n2_t), lambda bi, oi, i, j: (bi, 0, j)),
                pl.BlockSpec((d1p_p, o_t * d2p_p), lambda bi, oi, i, j: (0, oi)),
            ],
            out_specs=pl.BlockSpec((1, o_t, n1_t, n2_t),
                                   lambda bi, oi, i, j: (bi, oi, i, j)),
            scratch_shapes=[pltpu.VMEM((o_t * n1_t, d2p_p), compute_dtype)],
        ),
        compiler_params=pltpu.CompilerParams(
            dimension_semantics=dim_sem,
            vmem_limit_bytes=vmem_limit),
        cost_estimate=pl.CostEstimate(flops=int(flops), transcendentals=0,
                                      bytes_accessed=int(bytes_accessed)),
    )(x1p, x2t, w2)

    out = out[:, :, :n1, :n2]                     # (b, O, n1, n2), padding dropped
    if not transpose_output:
        return out                                # kernel-native layout, no permute
    return jnp.transpose(out, (0, 2, 3, 1))       # PyTorch layout (b, n1, n2, O)


# ------------------------------ references -----------------------------------
def _reference_f32(x1, x2, weight, o, bias):
    # True f32 reference of the PyTorch module (layout (b, n1, n2, O)).
    b, n1, _ = x1.shape
    _, n2, _ = x2.shape
    if bias[0]:
        x1 = jnp.concatenate([x1, jnp.ones((b, n1, 1), x1.dtype)], -1)
    if bias[1]:
        x2 = jnp.concatenate([x2, jnp.ones((b, n2, 1), x2.dtype)], -1)
    d1p, d2p = x1.shape[-1], x2.shape[-1]
    lin = jnp.dot(x1.reshape(b * n1, d1p), weight,
                  preferred_element_type=jnp.float32).reshape(b, n1, o, d2p)
    return jnp.einsum('bikq,bjq->bijk', lin, x2,
                      preferred_element_type=jnp.float32)


def _reference_plan(x1, x2, weight, o, bias, compute_dtype=jnp.bfloat16,
                    out_dtype=jnp.bfloat16):
    # Reference mirroring the kernel's numeric plan (bf16 MXU inputs, f32
    # accumulation, bf16-rounded lin) for a tight correctness check.
    b, n1, _ = x1.shape
    _, n2, _ = x2.shape
    if bias[0]:
        x1 = jnp.concatenate([x1, jnp.ones((b, n1, 1), x1.dtype)], -1)
    if bias[1]:
        x2 = jnp.concatenate([x2, jnp.ones((b, n2, 1), x2.dtype)], -1)
    d1p, d2p = x1.shape[-1], x2.shape[-1]
    x1c, x2c, wc = (t.astype(compute_dtype) for t in (x1, x2, weight))
    lin = jnp.dot(x1c.reshape(b * n1, d1p), wc,
                  preferred_element_type=jnp.float32)
    lin = lin.reshape(b, n1, o, d2p).astype(compute_dtype)
    ref = jnp.einsum('bikq,bjq->bijk', lin, x2c,
                     preferred_element_type=jnp.float32)
    return ref.astype(out_dtype)


def _run_case(key, b, n1, n2, d1, d2, o, bias, **kw):
    k1, k2, k3 = jax.random.split(key, 3)
    x1 = jax.random.normal(k1, (b, n1, d1), jnp.float32)
    x2 = jax.random.normal(k2, (b, n2, d2), jnp.float32)
    d1p, d2p = d1 + int(bias[0]), d2 + int(bias[1])
    bound = 1.0 / math.sqrt(d1p)
    weight = jax.random.uniform(k3, (d1p, d2p * o), jnp.float32, -bound, bound)

    out = jax.block_until_ready(biaffine_forward(x1, x2, weight, o, bias, **kw))
    ref32 = _reference_f32(x1, x2, weight, o, bias)
    refpl = _reference_plan(x1, x2, weight, o, bias).astype(jnp.float32)
    if not kw.get("transpose_output", True):
        ref32 = jnp.transpose(ref32, (0, 3, 1, 2))
        refpl = jnp.transpose(refpl, (0, 3, 1, 2))
        assert out.shape == (b, o, n1, n2), out.shape
    else:
        assert out.shape == (b, n1, n2, o), out.shape
    outf = out.astype(jnp.float32)

    # Tight check vs. the matched bf16-input / f32-accumulate plan.
    assert jnp.allclose(outf, refpl, atol=2e-2, rtol=2e-2), \
        float(jnp.max(jnp.abs(outf - refpl)))
    # Loose check vs. the true f32 reference; bf16 inputs plus the bf16-rounded
    # intermediate bound the absolute error at ~1e-1 for these magnitudes.
    assert jnp.allclose(outf, ref32, atol=2.5e-1, rtol=2.5e-2), \
        float(jnp.max(jnp.abs(outf - ref32)))


if __name__ == "__main__":
    root = jax.random.PRNGKey(0)
    ka, kb, kc = jax.random.split(root, 3)

    # 1) nominal small config (single tile on every axis)
    _run_case(ka, b=2, n1=8, n2=8, d1=32, d2=32, o=4, bias=(True, True))

    # 2) n1/n2 tiling + lin-scratch reuse across the n2 sweep
    _run_case(kb, b=2, n1=40, n2=256, d1=16, d2=24, o=3, bias=(True, False),
              n1_tile=16, n2_tile=128)

    # 3) O-axis blocking (o_t=2 of O=6), ragged n2, kernel-native output layout
    _run_case(kc, b=1, n1=24, n2=136, d1=20, d2=36, o=6, bias=(False, True),
              o_tile=2, n2_tile=128, transpose_output=False)

    print("KERNEL_OK")
</pallas_src>

<mosaic_0001>
module attributes {stable_mosaic.version = 11 : i64} {
  func.func @_biaffine_kernel(%arg0: i32, %arg1: i32, %arg2: i32, %arg3: i32, %arg4: memref<1x16x128xbf16, #tpu.memory_space<vmem>>, %arg5: memref<1x128x128xbf16, #tpu.memory_space<vmem>>, %arg6: memref<128x512xbf16, #tpu.memory_space<vmem>>, %arg7: memref<1x4x16x128xbf16, #tpu.memory_space<vmem>>, %arg8: memref<64x128xbf16, #tpu.memory_space<vmem>>) attributes {dimension_semantics = [#tpu.dimension_semantics<parallel>, #tpu.dimension_semantics<parallel>, #tpu.dimension_semantics<parallel>, #tpu.dimension_semantics<arbitrary>], iteration_bounds = array<i64: 2, 1, 1, 1>, scalar_prefetch = 0 : i64, scratch_operands = 1 : i64, tpu.core_type = #tpu.core_type<tc>, window_params = [{transform_indices = @transform_0, window_bounds = array<i64: 1, 16, 128>}, {transform_indices = @transform_1, window_bounds = array<i64: 1, 128, 128>}, {transform_indices = @transform_2, window_bounds = array<i64: 128, 512>}, {transform_indices = @transform_3, window_bounds = array<i64: 1, 4, 16, 128>}]} {
    %c0_i32 = arith.constant 0 : i32
    %0 = arith.cmpi eq, %arg3, %c0_i32 : i32
    %1 = arith.extui %0 : i1 to i32
    %c0_i32_0 = arith.constant 0 : i32
    %2 = arith.cmpi ne, %1, %c0_i32_0 : i32
    scf.if %2 {
      %c0_9 = arith.constant 0 : index
      %c0_10 = arith.constant 0 : index
      %c0_11 = arith.constant 0 : index
      %12 = vector.load %arg4[%c0_9, %c0_10, %c0_11] : memref<1x16x128xbf16, #tpu.memory_space<vmem>>, vector<1x16x128xbf16>
      %13 = vector.shape_cast %12 : vector<1x16x128xbf16> to vector<16x128xbf16>
      %c0_12 = arith.constant 0 : index
      %c0_13 = arith.constant 0 : index
      %14 = vector.load %arg6[%c0_12, %c0_13] : memref<128x512xbf16, #tpu.memory_space<vmem>>, vector<128x128xbf16>
      %cst_14 = arith.constant dense<0.000000e+00> : vector<16x128xf32>
      %15 = tpu.matmul %13, %14, %cst_14 {dimension_numbers = #tpu.dot_dimension_numbers<[1], [0], [0], [1], [0, 0, 1, 1], [], []>} : vector<16x128xbf16>, vector<128x128xbf16>, vector<16x128xf32> -> vector<16x128xf32>
      %16 = arith.truncf %15 : vector<16x128xf32> to vector<16x128xbf16>
      %c0_15 = arith.constant 0 : index
      %c0_16 = arith.constant 0 : index
      %17 = vector.load %arg8[%c0_15, %c0_16] : memref<64x128xbf16, #tpu.memory_space<vmem>>, vector<16x128xbf16>
      tpu.vector_store %arg8[%c0_15, %c0_16], %16 {strides = array<i32>} : memref<64x128xbf16, #tpu.memory_space<vmem>>, vector<16x128xbf16>,
      %c0_17 = arith.constant 0 : index
      %c128 = arith.constant 128 : index
      %18 = vector.load %arg6[%c0_17, %c128] : memref<128x512xbf16, #tpu.memory_space<vmem>>, vector<128x128xbf16>
      %cst_18 = arith.constant dense<0.000000e+00> : vector<16x128xf32>
      %19 = tpu.matmul %13, %18, %cst_18 {dimension_numbers = #tpu.dot_dimension_numbers<[1], [0], [0], [1], [0, 0, 1, 1], [], []>} : vector<16x128xbf16>, vector<128x128xbf16>, vector<16x128xf32> -> vector<16x128xf32>
      %20 = arith.truncf %19 : vector<16x128xf32> to vector<16x128xbf16>
      %c16 = arith.constant 16 : index
      %c0_19 = arith.constant 0 : index
      %21 = vector.load %arg8[%c16, %c0_19] : memref<64x128xbf16, #tpu.memory_space<vmem>>, vector<16x128xbf16>
      tpu.vector_store %arg8[%c16, %c0_19], %20 {strides = array<i32>} : memref<64x128xbf16, #tpu.memory_space<vmem>>, vector<16x128xbf16>,
      %c0_20 = arith.constant 0 : index
      %c256 = arith.constant 256 : index
      %22 = vector.load %arg6[%c0_20, %c256] : memref<128x512xbf16, #tpu.memory_space<vmem>>, vector<128x128xbf16>
      %cst_21 = arith.constant dense<0.000000e+00> : vector<16x128xf32>
      %23 = tpu.matmul %13, %22, %cst_21 {dimension_numbers = #tpu.dot_dimension_numbers<[1], [0], [0], [1], [0, 0, 1, 1], [], []>} : vector<16x128xbf16>, vector<128x128xbf16>, vector<16x128xf32> -> vector<16x128xf32>
      %24 = arith.truncf %23 : vector<16x128xf32> to vector<16x128xbf16>
      %c32 = arith.constant 32 : index
      %c0_22 = arith.constant 0 : index
      %25 = vector.load %arg8[%c32, %c0_22] : memref<64x128xbf16, #tpu.memory_space<vmem>>, vector<16x128xbf16>
      tpu.vector_store %arg8[%c32, %c0_22], %24 {strides = array<i32>} : memref<64x128xbf16, #tpu.memory_space<vmem>>, vector<16x128xbf16>,
      %c0_23 = arith.constant 0 : index
      %c384 = arith.constant 384 : index
      %26 = vector.load %arg6[%c0_23, %c384] : memref<128x512xbf16, #tpu.memory_space<vmem>>, vector<128x128xbf16>
      %cst_24 = arith.constant dense<0.000000e+00> : vector<16x128xf32>
      %27 = tpu.matmul %13, %26, %cst_24 {dimension_numbers = #tpu.dot_dimension_numbers<[1], [0], [0], [1], [0, 0, 1, 1], [], []>} : vector<16x128xbf16>, vector<128x128xbf16>, vector<16x128xf32> -> vector<16x128xf32>
      %28 = arith.truncf %27 : vector<16x128xf32> to vector<16x128xbf16>
      %c48 = arith.constant 48 : index
      %c0_25 = arith.constant 0 : index
      %29 = vector.load %arg8[%c48, %c0_25] : memref<64x128xbf16, #tpu.memory_space<vmem>>, vector<16x128xbf16>
      tpu.vector_store %arg8[%c48, %c0_25], %28 {strides = array<i32>} : memref<64x128xbf16, #tpu.memory_space<vmem>>, vector<16x128xbf16>,
    } else {
    }
    %c0 = arith.constant 0 : index
    %c0_1 = arith.constant 0 : index
    %3 = vector.load %arg8[%c0, %c0_1] : memref<64x128xbf16, #tpu.memory_space<vmem>>, vector<64x128xbf16>
    %c0_2 = arith.constant 0 : index
    %c0_3 = arith.constant 0 : index
    %c0_4 = arith.constant 0 : index
    %4 = vector.load %arg5[%c0_2, %c0_3, %c0_4] : memref<1x128x128xbf16, #tpu.memory_space<vmem>>, vector<1x128x128xbf16>
    %5 = vector.shape_cast %4 : vector<1x128x128xbf16> to vector<128x128xbf16>
    %cst = arith.constant dense<0.000000e+00> : vector<64x128xf32>
    %6 = tpu.matmul %3, %5, %cst {dimension_numbers = #tpu.dot_dimension_numbers<[1], [0], [0], [1], [0, 0, 1, 1], [], []>} : vector<64x128xbf16>, vector<128x128xbf16>, vector<64x128xf32> -> vector<64x128xf32>
    %7 = vector.shape_cast %6 : vector<64x128xf32> to vector<4x16x128xf32>
    %8 = arith.truncf %7 : vector<4x16x128xf32> to vector<4x16x128xbf16>
    %c0_5 = arith.constant 0 : index
    %c0_6 = arith.constant 0 : index
    %c0_7 = arith.constant 0 : index
    %c0_8 = arith.constant 0 : index
    %9 = vector.load %arg7[%c0_5, %c0_6, %c0_7, %c0_8] : memref<1x4x16x128xbf16, #tpu.memory_space<vmem>>, vector<1x4x16x128xbf16>
    %10 = vector.shape_cast %9 : vector<1x4x16x128xbf16> to vector<4x16x128xbf16>
    %11 = vector.shape_cast %8 : vector<4x16x128xbf16> to vector<1x4x16x128xbf16>
    tpu.vector_store %arg7[%c0_5, %c0_6, %c0_7, %c0_8], %11 {strides = array<i32>} : memref<1x4x16x128xbf16, #tpu.memory_space<vmem>>, vector<1x4x16x128xbf16>,
    return
  }
  func.func @transform_0(%arg0: i32, %arg1: i32, %arg2: i32, %arg3: i32) -> (i32, i32, i32) {
    %c0_i32 = arith.constant 0 : i32
    %c0_i32_0 = arith.constant 0 : i32
    return %arg0, %arg2, %c0_i32 : i32, i32, i32
  }
  func.func @transform_1(%arg0: i32, %arg1: i32, %arg2: i32, %arg3: i32) -> (i32, i32, i32) {
    %c0_i32 = arith.constant 0 : i32
    %c0_i32_0 = arith.constant 0 : i32
    return %arg0, %c0_i32, %arg3 : i32, i32, i32
  }
  func.func @transform_2(%arg0: i32, %arg1: i32, %arg2: i32, %arg3: i32) -> (i32, i32) {
    %c0_i32 = arith.constant 0 : i32
    %c0_i32_0 = arith.constant 0 : i32
    return %c0_i32, %arg1 : i32, i32
  }
  func.func @transform_3(%arg0: i32, %arg1: i32, %arg2: i32, %arg3: i32) -> (i32, i32, i32, i32) {
    %c0_i32 = arith.constant 0 : i32
    return %arg0, %arg1, %arg2, %arg3 : i32, i32, i32, i32
  }
}

</mosaic_0001>

<bundles_post_ra>
// kernel: tpu_custom_call.1
= control target key start
LH: loop header
LB: loop body
LE: loop exit
PB: predicated region body
PF: predicated region fallthrough
CT: control target
= control target key end

     0   :  { %s1983_s0 = inlined_call_operand.hbm [shape: bf16[2,16,128], index: 0, kind: input, shape index: {}]   ;;  %s1984_s1 = inlined_call_operand.hbm [shape: bf16[2,128,128], index: 1, kind: input, shape index: {}]   ;;  %s1985_s2 = inlined_call_operand.hbm [shape: bf16[128,512], index: 2, kind: input, shape index: {}]   ;;  %s1986_s3 = inlined_call_operand.hbm [shape: bf16[2,4,16,128], index: 3, kind: output, shape index: {}]  }
   0x1   :  { %1991 = sst [smem:[#allocation15_spill]] %s1983_s0 }
   0x2   :  { %1992 = sst [smem:[#allocation16_spill]] %s1985_s2 }
   0x3   :  { %8 = vsyncpa [#allocation4], 0 }
   0x4   :  { %10 = vsyncpa [#allocation4 + $0x1], 0 }
   0x5   :  { %11 = vsyncpa [#allocation7], 0 }
   0x6   :  { %13 = vsyncpa [#allocation7 + $0x1], 0 }
   0x7   :  { %14 = vsyncpa [#allocation5], 0 }
   0x8   :  { %16 = vsyncpa [#allocation5 + $0x1], 0  ;;  %s1655_s12 = smov 0   ;;  %s1657_s13 = smov 0  }
   0x9   :  { %s1659_s14 = smov 0   ;;  %s1661_s15 = smov 0  }
   0xa   :  { %s1663_s16 = smov 0   ;;  %s1665_s17 = smov 0  }
   0xb LB: > { %s1686_s18 = sadd.s32 4294967295, %s1621_s17   ;;  %s1061_s19 = sadd.s32 4294967294, %s1621_s17   ;;  %s1621_s17 = sphi %s1665_s17, %s22_s17   ;;  %s1617_s16 = sphi %s1663_s16, %s2016_s16   ;;  %s1613_s15 = sphi %s1661_s15, %s2015_s15   ;;  %s1609_s14 = sphi %s1659_s14, %s2014_s14   ;;  %s1605_s13 = sphi %s1657_s13, %s2013_s13   ;;  %s1601_s12 = sphi %s1655_s12, %s2012_s12  }
   0xc   : > { %p70_p0 = scmp.ne.s32.totalorder %s1605_s13, %s1601_s12  ;;  %p1987_p1 = scmp.eq.s32.totalorder %s1686_s18, 0 }
   0xd   : > { %p160_p3 = scmp.eq.s32.totalorder %s1061_s19, 1  ;;  %p1062_p5 = scmp.ge.s32.totalorder %s1621_s17, 1 }
   0xe   : > { %p1695_p4 = por %p1987_p1, %p70_p0  ;;  %p167_p7 = scmp.lt.s32.totalorder %s1621_s17, 3 }
   0xf   : > { %p1700_p6 = por %p160_p3, %p70_p0  ;;  %s1623_s23 = smov [#allocation8]  }
  0x10   : > { %s1993_s20 = scalar_select %p1695_p4, 1, 0 }
  0x11   : > { %s1994_s21 = scalar_select %p1700_p6, 1, 0 }
  0x12   : > { %p1705_p8 = pnand %p1062_p5, %p167_p7  ;;  %s182_s24 = sshll.u32 %s1623_s23, 4  ;;  %s183_s24 = int_to_ptr.vmem [resolvable:$true] %s182_s24 }
  0x13   : > { %s48_s26 = sadd.s32 1, %s1617_s16  ;;  %s1997_s2 = sld [smem:[#allocation16_spill]] }
  0x14   : > { %s1995_s22 = scalar_select %p1705_p8, 1, 0 }
  0x15   : > { %p1326_p9 = pneg %p1705_p8 }
  0x17   : > { %p1714_p11 = pnand %p1326_p9, %p1987_p1 }
  0x19   : > { %s1443_s29 = scalar_lea.hbm %s1997_s2, 4096  ;;  %p1445_p13 = pneg %p1714_p11 }
  0x1a   : > { %p1444_p12 = scmp.ne.s32.totalorder %s1997_s2, %s1443_s29  ;;  %p1450_p5 = scmp.lt.u32.totalorder %s1443_s29, %s1997_s2 }
  0x1c   : > { %p1446_p0 = pnand %p1445_p13, %p1444_p12 }
  0x1e   : > { %p1447_p3 = pneg %p1446_p0 }
  0x20   : > { %p1452_p7 = pnand %p1450_p5, %p1447_p3 }
  0x22   : > { %1455 = shalt.err (!%p1452_p7)
}
  0x23   : > { %s1456_s7 = scalar_lea.vmem %s183_s24, 4096  ;;  %p1464_p2 = scmp.lt.s32.totalorder %s183_s24, %s183_s24 }
  0x24   : > { %p1457_p9 = scmp.ne.s32.totalorder %s183_s24, %s1456_s7  ;;  %p1465_p6 = scmp.lt.s32.totalorder %s1456_s7, %s1456_s7 }
  0x26   : > { %p1459_p10 = pnand %p1457_p9, %p1445_p13  ;;  %p1466_p4 = por %p1465_p6, %p1464_p2 }
  0x28   : > { %p1460_p1 = pneg %p1459_p10 }
  0x2a   : > { %p1467_p8 = pnand %p1466_p4, %p1460_p1 }
  0x2c   : > { %1470 = shalt.err (!%p1467_p8)
}
  0x2d   : > { %s1624_s8 = smov 256   ;;  %s1625_s9 = smov 16  }
  0x2e   : > { %1329 = dma.hbm_to_vmem [thread:$0]  (!%p1714_p11), %s1997_s2, 4096, %s183_s24, [#allocation7], %s1624_s8, %s1624_s8, %s1625_s9  }
  0x2f   : > { %p50_p1 = scmp.ge.s32.totalorder %s48_s26, 2  ;;  %s57_s19 = sadd.s32 1, %s1609_s14 }
  0x30   : > { %p64_p2 = scmp.ne.s32.totalorder %s1609_s14, %s1605_s13  ;;  %p65_p4 = scmp.eq.s32.totalorder %s1621_s17, 0 }
  0x31   : > { %s2018_s26 = smov (%p50_p1, %s48_s26), 0  ;;  %p2000_p8 = scmp.eq.s32.totalorder %s1686_s18, 1 }
  0x32   : > { %1998 = sst [smem:[#allocation14_spill]] %s2018_s26  ;;  %p1741_p6 = por %p65_p4, %p64_p2 }
  0x33   : > { %p1747_p10 = por %p2000_p8, %p64_p2  ;;  %s52_s27 = ssub.s32 %s1617_s16, %s2018_s26 }
  0x34   : > { %p1342_p11 = scmp.lt.s32.totalorder %s1621_s17, 2  ;;  %p55_p12 = scmp.eq.s32.totalorder %s52_s27, 0 }
  0x35   : > { %s1755_s24 = sand.u32 1, %s1609_s14   ;;  %s1130_s30 = sshll.u32 %s1617_s16, 7 }
  0x36   : > { %s1065_s28 = sshll.u32 %s1755_s24, 3  ;;  %s2002_s0 = sld [smem:[#allocation15_spill]] }
  0x37   : > { %s1759_s29 = scalar_select %p55_p12, %s1609_s14, %s57_s19  }
  0x38   : > { %s200_s7 = scalar_lea.vmem [#allocation3], %s1065_s28  ;;  %p1771_p13 = pnand %p1342_p11, %p1741_p6 }
  0x39   : > { %s209_s8 = sshll.u32 %s200_s7, 4  ;;  %s197_s11 = scalar_lea.sflag [#allocation4], %s1755_s24  ;;  %s1767_s8 = int_to_ptr.vmem [resolvable:$true] %s209_s8 }
  0x3a   : > { %p1473_p3 = pneg %p1771_p13 }
  0x3c   : > { %s1765_s6 = scalar_lea.hbm %s2002_s0, %s1130_s30  ;;  %s1476_s23 = scalar_lea.hbm %s2002_s0, 256 }
  0x3d   : > { %s1471_s19 = scalar_lea.hbm %s1765_s6, 128  ;;  %p1477_p9 = scmp.lt.u32.totalorder %s1765_s6, %s2002_s0 }
  0x3e   : > { %p1472_p0 = scmp.ne.s32.totalorder %s1765_s6, %s1471_s19  ;;  %p1478_p1 = scmp.lt.u32.totalorder %s1476_s23, %s1471_s19 }
  0x3f   : > { %p1480_p4 = scmp.lt.u32.totalorder %s1471_s19, %s1765_s6 }
  0x40   : > { %p1474_p5 = pnand %p1473_p3, %p1472_p0  ;;  %p1479_p2 = por %p1478_p1, %p1477_p9 }
  0x42   : > { %p1475_p7 = pneg %p1474_p5  ;;  %p1481_p6 = por %p1480_p4, %p1479_p2 }
  0x44   : > { %p1482_p8 = pnand %p1481_p6, %p1475_p7 }
  0x46   : > { %1485 = shalt.err (!%p1482_p8)
}
  0x47   : > { %s1486_s5 = scalar_lea.vmem %s1767_s8, 128  ;;  %s1626_s7 = smov [#allocation3]  }
  0x48   : > { %p1487_p11 = scmp.ne.s32.totalorder %s1767_s8, %s1486_s5  ;;  %s1491_s27 = sshll.u32 %s1626_s7, 4  ;;  %s1492_s27 = int_to_ptr.vmem [resolvable:$false] %s1491_s27 }
  0x49   : > { %s1493_s28 = scalar_lea.vmem %s1492_s27, 256  ;;  %p1494_p5 = scmp.lt.s32.totalorder %s1767_s8, %s1492_s27 }
  0x4a   : > { %p1489_p12 = pnand %p1487_p11, %p1473_p3  ;;  %p1495_p9 = scmp.lt.s32.totalorder %s1493_s28, %s1486_s5 }
  0x4c   : > { %p1490_p0 = pneg %p1489_p12  ;;  %p1496_p1 = por %p1495_p9, %p1494_p5 }
  0x4e   : > { %p1497_p2 = pnand %p1496_p1, %p1490_p0 }
  0x50   : > { %1500 = shalt.err (!%p1497_p2)
}
  0x51   : > { %s1627_s19 = smov 64   ;;  %s1628_s23 = smov 4  }
  0x52   : > { %1333 = dma.hbm_to_vmem [thread:$0]  (!%p1771_p13), %s1765_s6, 128, %s1767_s8, %s197_s11, %s1627_s19, %s1627_s19, %s1628_s23  }
  0x53   : > { %s1068_s30 = sshll.u32 %s1755_s24, 6  ;;  %s1131_s4 = sshll.u32 %s1617_s16, 10 }
  0x54   : > { %s1812_s27 = scalar_lea.hbm %s1984_s1, %s1131_s4  ;;  %s223_s28 = scalar_lea.vmem [#allocation6], %s1068_s30 }
  0x55   : > { %s231_s10 = sshll.u32 %s223_s28, 4  ;;  %s2004_s0 = sand.u32 1, %s1621_s17   ;;  %s1814_s10 = int_to_ptr.vmem [resolvable:$true] %s231_s10 }
  0x56   : > { %s1818_s2 = scalar_lea.sflag [#allocation7], %s2004_s0  ;;  %s1501_s26 = scalar_lea.hbm %s1812_s27, 1024 }
  0x57   : > { %p1502_p7 = scmp.ne.s32.totalorder %s1812_s27, %s1501_s26  ;;  %s1506_s8 = scalar_lea.hbm %s1984_s1, 2048 }
  0x58   : > { %p1507_p8 = scmp.lt.u32.totalorder %s1812_s27, %s1984_s1  ;;  %p1508_p11 = scmp.lt.u32.totalorder %s1506_s8, %s1501_s26 }
  0x59   : > { %p1504_p4 = pnand %p1502_p7, %p1473_p3  ;;  %p1510_p0 = scmp.lt.u32.totalorder %s1501_s26, %s1812_s27 }
  0x5a   : > { %p1509_p12 = por %p1508_p11, %p1507_p8 }
  0x5b   : > { %p1505_p6 = pneg %p1504_p4 }
  0x5c   : > { %p1511_p5 = por %p1510_p0, %p1509_p12 }
  0x5e   : > { %p1512_p9 = pnand %p1511_p5, %p1505_p6 }
  0x60   : > { %1515 = shalt.err (!%p1512_p9)
}
  0x61   : > { %s1516_s0 = scalar_lea.vmem %s1814_s10, 1024  ;;  %s1629_s30 = smov [#allocation6]  }
  0x62   : > { %p1517_p1 = scmp.ne.s32.totalorder %s1814_s10, %s1516_s0  ;;  %s1521_s5 = sshll.u32 %s1629_s30, 4  ;;  %s1522_s5 = int_to_ptr.vmem [resolvable:$false] %s1521_s5 }
  0x63   : > { %s1523_s7 = scalar_lea.vmem %s1522_s5, 2048  ;;  %p1524_p4 = scmp.lt.s32.totalorder %s1814_s10, %s1522_s5 }
  0x64   : > { %p1519_p2 = pnand %p1517_p1, %p1473_p3  ;;  %p1525_p8 = scmp.lt.s32.totalorder %s1523_s7, %s1516_s0 }
  0x66   : > { %p1520_p7 = pneg %p1519_p2  ;;  %p1526_p11 = por %p1525_p8, %p1524_p4 }
  0x68   : > { %p1527_p12 = pnand %p1526_p11, %p1520_p7 }
  0x6a   : > { %1530 = shalt.err (!%p1527_p12)
}
  0x6b   : > { %1336 = dma.hbm_to_vmem [thread:$0]  (!%p1771_p13), %s1812_s27, 1024, %s1814_s10, %s1818_s2, %s1627_s19, %s1627_s19, %s1628_s23  }
  0x6c   : > { %p2005_p3 = scmp.ne.s32.totalorder %s1995_s22, 0 }
  0x6d   : > { %s1850_s26 = sand.u32 (!%p2005_p3), 1, %s1605_s13   ;;  %p2006_p6 = scmp.ne.s32.totalorder (!%p2005_p3), %s1993_s20, 0 }
  0x6e   : > { %243 = sbr.rel (%p2005_p3) target bundleno = 670 (0x29e), region = 32  ;;  %s1072_s28 = sshll.u32 (!%p2005_p3), %s1850_s26, 3 }
  0x6f   : > { %s246_s24 = scalar_lea.sflag (!%p2005_p3), [#allocation4], %s1850_s26  ;;  %s1854_s6 = scalar_lea.vmem (!%p2005_p3), [#allocation3], %s1072_s28 }
  0x75   : > { %1584 = dma.done.wait (%p2006_p6), %s246_s24, 128  }
  0x76   : > { %1586 = vsyncadd (%p2006_p6), %s246_s24, 4294967168  ;;  %s254_s2 = sand.u32 1, %s1686_s18   ;;  %s1073_s22 = sshll.u32 %s1850_s26, 6 }
  0x77   : > { %s255_s9 = scalar_lea.sflag [#allocation7], %s254_s2  ;;  %s1862_s10 = scalar_lea.vmem [#allocation6], %s1073_s22 }
  0x78   : > { %1588 = dma.done.wait (%p2006_p6), %s255_s9, 1024  }
  0x79   : > { %1590 = vsyncadd (%p2006_p6), %s255_s9, 4294966272  ;;  %p2007_p13 = scmp.eq.s32.totalorder %s1686_s18, 0 }
  0x7b   : > { %1592 = dma.done.wait (%p2007_p13), [#allocation7], 4096   ;;  %p2008_p0 = pmov %p2007_p13 }
  0x7c   : > { %v1630_v0 = vmov 0.0   ;;  %vm1631_vm0 = vmmov 0   ;;  %v1402_v1 = vld [vmem:[#allocation8] ss:$16 sps:$4 sm:$0xff]   ;;  %v1419_v6 = vld [vmem:[#allocation8 + $0x8] ss:$16 sps:$4 sm:$0xff]  }
  0x7d   : > { %1594 = vsyncadd (%p2008_p0), [#allocation7], 4294963200  ;;  %1212 = vmatprep.subr.bf16.mxu1 %v1630_v0  ;;  %1228 = vmatprep.mubr.msk.bf16.mxu1 %vm1631_vm0, %v1630_v0  ;;  %v1403_v2 = vld [vmem:[#allocation8 + $0x20] ss:$16 sps:$4 sm:$0xff]   ;;  %v1420_v8 = vld [vmem:[#allocation8 + $0x28] ss:$16 sps:$4 sm:$0xff]  }
  0x7e   : > { %1252 = vmatprep.subr.bf16.mxu0 %v1630_v0  ;;  %1268 = vmatprep.mubr.msk.bf16.mxu0 %vm1631_vm0, %v1630_v0  ;;  %v1404_v3 = vld [vmem:[#allocation8 + $0x40] ss:$16 sps:$4 sm:$0xff]   ;;  %v1422_v10 = vld [vmem:[#allocation8 + $0x48] ss:$16 sps:$4 sm:$0xff]   ;;  %v1411_v14 = vld [vmem:[#allocation8 + $0x4] ss:$16 sps:$4 sm:$0xff]  }
  0x7f   : > { %1213 = vmatpush3.bf16.msra.mxu1 %v1402_v1  ;;  %v1405_v4 = vld [vmem:[#allocation8 + $0x60] ss:$16 sps:$4 sm:$0xff]   ;;  %1253 = vmatpush3.bf16.msra.mxu0 %v1419_v6  ;;  %v1424_v12 = vld [vmem:[#allocation8 + $0x68] ss:$16 sps:$4 sm:$0xff]   ;;  %v1412_v16 = vld [vmem:[#allocation8 + $0x24] ss:$16 sps:$4 sm:$0xff]  }
  0x80   : > { %1214 = vmatprep.subr.bf16.mxu1 %v1630_v0  ;;  %v1406_v5 = vld [vmem:[#allocation8 + $0x80] ss:$16 sps:$4 sm:$0xff]   ;;  %1254 = vmatprep.subr.bf16.mxu0 %v1630_v0  ;;  %v1426_v15 = vld [vmem:[#allocation8 + $0x88] ss:$16 sps:$4 sm:$0xff]   ;;  %v1413_v18 = vld [vmem:[#allocation8 + $0x44] ss:$16 sps:$4 sm:$0xff]  }
  0x81   : > { %v1407_v7 = vld [vmem:[#allocation8 + $0xa0] ss:$16 sps:$4 sm:$0xff]   ;;  %v1428_v17 = vld [vmem:[#allocation8 + $0xa8] ss:$16 sps:$4 sm:$0xff]   ;;  %v1414_v20 = vld [vmem:[#allocation8 + $0x64] ss:$16 sps:$4 sm:$0xff]  }
  0x82   : > { %v1408_v9 = vld [vmem:[#allocation8 + $0xc0] ss:$16 sps:$4 sm:$0xff]   ;;  %v1430_v19 = vld [vmem:[#allocation8 + $0xc8] ss:$16 sps:$4 sm:$0xff]   ;;  %v1415_v22 = vld [vmem:[#allocation8 + $0x84] ss:$16 sps:$4 sm:$0xff]  }
  0x83   : > { %1215 = vmatpush3.bf16.msra.mxu1 %v1403_v2  ;;  %1255 = vmatpush3.bf16.msra.mxu0 %v1420_v8  ;;  %v1409_v11 = vld [vmem:[#allocation8 + $0xe0] ss:$16 sps:$4 sm:$0xff]   ;;  %v1432_v21 = vld [vmem:[#allocation8 + $0xe8] ss:$16 sps:$4 sm:$0xff]   ;;  %v1416_v23 = vld [vmem:[#allocation8 + $0xa4] ss:$16 sps:$4 sm:$0xff]  }
  0x84   : > { %1216 = vmatprep.subr.bf16.mxu1 %v1630_v0  ;;  %1256 = vmatprep.subr.bf16.mxu0 %v1630_v0  ;;  %v1889_v13 = vld [vmem:[%s1854_s6] sm:$0xff]   ;;  %v1435_v34 = vld [vmem:[%s1862_s10] sm:$0xff]   ;;  %v1436_v35 = vld [vmem:[%s1862_s10 + $0x8] sm:$0xff]   ;;  %s1075_s18 = sshll.u32 %s1850_s26, 5  ;;  %s1140_s23 = sshll.u32 %s1613_s15, 9 }
  0x85   : > { %v1417_v24 = vld [vmem:[#allocation8 + $0xc4] ss:$16 sps:$4 sm:$0xff]   ;;  %v1421_v26 = vld [vmem:[#allocation8 + $0xc] ss:$16 sps:$4 sm:$0xff]   ;;  %s289_s20 = scalar_lea.vmem [#allocation9], %s1075_s18  ;;  %s1934_s11 = scalar_lea.hbm %s1986_s3, %s1140_s23 }
  0x86   : > { %v1418_v25 = vld [vmem:[#allocation8 + $0xe4] ss:$16 sps:$4 sm:$0xff]   ;;  %v1423_v27 = vld [vmem:[#allocation8 + $0x2c] ss:$16 sps:$4 sm:$0xff]   ;;  %s928_s19 = sshll.u32 %s289_s20, 4  ;;  %s909_s4 = scalar_lea.sflag [#allocation5], %s1850_s26  ;;  %s1929_s19 = int_to_ptr.vmem [resolvable:$true] %s928_s19 }
  0x87   : > { %1217 = vmatpush3.bf16.msra.mxu1 %v1404_v3  ;;  %1257 = vmatpush3.bf16.msra.mxu0 %v1422_v10  ;;  %v1425_v28 = vld [vmem:[#allocation8 + $0x4c] ss:$16 sps:$4 sm:$0xff]   ;;  %v1437_v36 = vld [vmem:[%s1862_s10 + $0x10] sm:$0xff]   ;;  %v1439_v38 = vld [vmem:[%s1862_s10 + $0x20] sm:$0xff]   ;;  %s1531_s0 = scalar_lea.vmem %s1929_s19, 512  ;;  %s1632_s15 = smov [#allocation9]  }
  0x88   : > { %1218 = vmatprep.subr.bf16.mxu1 %v1630_v0  ;;  %1258 = vmatprep.subr.bf16.mxu0 %v1630_v0  ;;  %v1427_v29 = vld [vmem:[#allocation8 + $0x6c] ss:$16 sps:$4 sm:$0xff]   ;;  %v1441_v40 = vld [vmem:[%s1862_s10 + $0x30] sm:$0xff]   ;;  %p1532_p5 = scmp.ne.s32.totalorder %s1929_s19, %s1531_s0  ;;  %s1535_s30 = sshll.u32 %s1632_s15, 4  ;;  %s1536_s30 = int_to_ptr.vmem [resolvable:$false] %s1535_s30 }
  0x89   : > { %v1429_v30 = vld [vmem:[#allocation8 + $0x8c] ss:$16 sps:$4 sm:$0xff]   ;;  %s1537_s5 = scalar_lea.vmem %s1536_s30, 1024  ;;  %p1538_p2 = scmp.lt.s32.totalorder %s1929_s19, %s1536_s30 }
  0x8a   : > { %v1431_v31 = vld [vmem:[#allocation8 + $0xac] ss:$16 sps:$4 sm:$0xff]   ;;  %p1533_p9 = pnand %p1532_p5, %p1747_p10  ;;  %p1539_p7 = scmp.lt.s32.totalorder %s1537_s5, %s1531_s0 }
  0x8b   : > { %1219 = vmatpush3.bf16.msra.mxu1 %v1405_v4  ;;  %1259 = vmatpush3.bf16.msra.mxu0 %v1424_v12  ;;  %v1433_v32 = vld [vmem:[#allocation8 + $0xcc] ss:$16 sps:$4 sm:$0xff]  }
  0x8c   : > { %1220 = vmatprep.subr.bf16.mxu1 %v1630_v0  ;;  %1260 = vmatprep.subr.bf16.mxu0 %v1630_v0  ;;  %v1434_v33 = vld [vmem:[#allocation8 + $0xec] ss:$16 sps:$4 sm:$0xff]   ;;  %p1534_p1 = pneg %p1533_p9  ;;  %p1540_p4 = por %p1539_p7, %p1538_p2 }
  0x8d   : > { %v1438_v37 = vld [vmem:[%s1862_s10 + $0x18] sm:$0xff]   ;;  %v1440_v39 = vld [vmem:[%s1862_s10 + $0x28] sm:$0xff]  }
  0x8e   : > { %v1442_v41 = vld [vmem:[%s1862_s10 + $0x38] sm:$0xff]   ;;  %p1541_p8 = pnand %p1540_p4, %p1534_p1 }
  0x8f   : > { %1221 = vmatpush3.bf16.msra.mxu1 %v1406_v5  ;;  %1261 = vmatpush3.bf16.msra.mxu0 %v1426_v15 }
  0x90   : > { %1222 = vmatprep.subr.bf16.mxu1 %v1630_v0  ;;  %1262 = vmatprep.subr.bf16.mxu0 %v1630_v0 }
  0x93   : > { %1223 = vmatpush3.bf16.msra.mxu1 %v1407_v7  ;;  %1263 = vmatpush3.bf16.msra.mxu0 %v1428_v17 }
  0x94   : > { %1224 = vmatprep.subr.bf16.mxu1 %v1630_v0  ;;  %1264 = vmatprep.subr.bf16.mxu0 %v1630_v0 }
  0x97   : > { %1225 = vmatpush3.bf16.msra.mxu1 %v1408_v9  ;;  %1265 = vmatpush3.bf16.msra.mxu0 %v1430_v19 }
  0x98   : > { %1226 = vmatprep.subr.bf16.mxu1 %v1630_v0  ;;  %1266 = vmatprep.subr.bf16.mxu0 %v1630_v0 }
  0x9b   : > { %1227 = vmatpush3.bf16.msra.mxu1 %v1409_v11  ;;  %1267 = vmatpush3.bf16.msra.mxu0 %v1432_v21 }
  0x9c   : > { %1232 = vmatprep.subr.bf16.mxu1 %v1630_v0  ;;  %1292 = vmatprep.subr.bf16.mxu0 %v1435_v34 }
  0x9e   : > { %1229 = vmatmul.mubr.bf16.vlgmr.msra.gmra.mrb[0].mxu1 %v1889_v13  ;;  %1269 = vmatmul.mubr.bf16.vlgmr.msra.gmra.mrb[0].mxu0 %v1889_v13 }
  0x9f   : > { %1233 = vmatpush3.bf16.msra.mxu1 %v1411_v14  ;;  %1248 = vmatprep.mubr.msk.bf16.mxu1 %vm1631_vm0, %v1630_v0 }
  0xa0   : > { %1234 = vmatprep.subr.bf16.mxu1 %v1630_v0  ;;  %1293 = vmatpush3.bf16.msra.mxu0 %v1435_v34 }
  0xa1   : > { %1294 = vmatprep.subr.bf16.mxu0 %v1436_v35 }
  0xa3   : > { %1235 = vmatpush3.bf16.msra.mxu1 %v1412_v16 }
  0xa4   : > { %1236 = vmatprep.subr.bf16.mxu1 %v1630_v0  ;;  %1295 = vmatpush3.bf16.msra.mxu0 %v1436_v35 }
  0xa5   : > { %1296 = vmatprep.subr.bf16.mxu0 %v1437_v36 }
  0xa7   : > { %1237 = vmatpush3.bf16.msra.mxu1 %v1413_v18 }
  0xa8   : > { %1238 = vmatprep.subr.bf16.mxu1 %v1630_v0  ;;  %1297 = vmatpush3.bf16.msra.mxu0 %v1437_v36 }
  0xa9   : > { %1298 = vmatprep.subr.bf16.mxu0 %v1438_v37 }
  0xab   : > { %1239 = vmatpush3.bf16.msra.mxu1 %v1414_v20 }
  0xac   : > { %1240 = vmatprep.subr.bf16.mxu1 %v1630_v0  ;;  %1299 = vmatpush3.bf16.msra.mxu0 %v1438_v37 }
  0xad   : > { %1300 = vmatprep.subr.bf16.mxu0 %v1439_v38 }
  0xaf   : > { %1241 = vmatpush3.bf16.msra.mxu1 %v1415_v22 }
  0xb0   : > { %1242 = vmatprep.subr.bf16.mxu1 %v1630_v0  ;;  %1301 = vmatpush3.bf16.msra.mxu0 %v1439_v38 }
  0xb1   : > { %1302 = vmatprep.subr.bf16.mxu0 %v1440_v39 }
  0xb3   : > { %1243 = vmatpush3.bf16.msra.mxu1 %v1416_v23 }
  0xb4   : > { %1244 = vmatprep.subr.bf16.mxu1 %v1630_v0  ;;  %1303 = vmatpush3.bf16.msra.mxu0 %v1440_v39 }
  0xb5   : > { %1304 = vmatprep.subr.bf16.mxu0 %v1441_v40 }
  0xb7   : > { %1245 = vmatpush3.bf16.msra.mxu1 %v1417_v24 }
  0xb8   : > { %1246 = vmatprep.subr.bf16.mxu1 %v1630_v0  ;;  %1305 = vmatpush3.bf16.msra.mxu0 %v1441_v40 }
  0xb9   : > { %1306 = vmatprep.subr.bf16.mxu0 %v1442_v41 }
  0xbb   : > { %1247 = vmatpush3.bf16.msra.mxu1 %v1418_v25 }
  0xbc   : > { %1272 = vmatprep.subr.bf16.mxu1 %v1630_v0  ;;  %1307 = vmatpush3.bf16.msra.mxu0 %v1442_v41 }
  0xbe   : > { %1249 = vmatmul.mubr.bf16.vlgmr.msra.gmra.mrb[4].mxu1 %v1889_v13 }
  0xbf   : > { %1273 = vmatpush3.bf16.msra.mxu1 %v1421_v26  ;;  %1288 = vmatprep.mubr.msk.bf16.mxu1 %vm1631_vm0, %v1630_v0 }
  0xc0   : > { %1274 = vmatprep.subr.bf16.mxu1 %v1630_v0 }
  0xc3   : > { %1275 = vmatpush3.bf16.msra.mxu1 %v1423_v27 }
  0xc4   : > { %1276 = vmatprep.subr.bf16.mxu1 %v1630_v0 }
  0xc7   : > { %1277 = vmatpush3.bf16.msra.mxu1 %v1425_v28 }
  0xc8   : > { %1278 = vmatprep.subr.bf16.mxu1 %v1630_v0 }
  0xcb   : > { %1279 = vmatpush3.bf16.msra.mxu1 %v1427_v29 }
  0xcc   : > { %1280 = vmatprep.subr.bf16.mxu1 %v1630_v0 }
  0xcf   : > { %1281 = vmatpush3.bf16.msra.mxu1 %v1429_v30 }
  0xd0   : > { %1282 = vmatprep.subr.bf16.mxu1 %v1630_v0 }
  0xd3   : > { %1283 = vmatpush3.bf16.msra.mxu1 %v1431_v31 }
  0xd4   : > { %1284 = vmatprep.subr.bf16.mxu1 %v1630_v0 }
  0xd7   : > { %1285 = vmatpush3.bf16.msra.mxu1 %v1433_v32 }
  0xd8   : > { %1286 = vmatprep.subr.bf16.mxu1 %v1630_v0 }
  0xdb   : > { %1287 = vmatpush3.bf16.msra.mxu1 %v1434_v33 }
  0xde   : > { %1289 = vmatmul.mubr.bf16.vlgmr.msra.gmra.mrb[8].mxu1 %v1889_v13 }
 0x171   : > { %v405_v42 = vpop.f32.mrb[0].mxu1  ;;  %v619_v47 = vpop.f32.mrb[0].mxu0 }
 0x172   : > { %v1230_v43 = vpop.f32.mrb[1].mxu1  ;;  %v1270_v48 = vpop.f32.mrb[1].mxu0 }
 0x173   : > { %v408_v44 = vpop.f32.mrb[2].mxu1  ;;  %v622_v49 = vpop.f32.mrb[2].mxu0 }
 0x174   : > { %v412_v45 = vpack.c.bf16 %v408_v44, %v405_v42  ;;  %v1231_v46 = vpop.f32.mrb[3].mxu1  ;;  %v626_v50 = vpack.c.bf16 %v622_v49, %v619_v47  ;;  %v1271_v51 = vpop.f32.mrb[3].mxu0 }
 0x176   : > { %1308 = vmatprep.mubr.bf16.mxu0 %v412_v45 }
 0x191   : > { %v512_v52 = vpop.f32.mrb[4].mxu1 }
 0x192   : > { %v1250_v53 = vpop.f32.mrb[5].mxu1 }
 0x193   : > { %v515_v54 = vpop.f32.mrb[6].mxu1 }
 0x194   : > { %v519_v55 = vpack.c.bf16 %v515_v54, %v512_v52  ;;  %v1251_v56 = vpop.f32.mrb[7].mxu1 }
 0x196   : > { %1309 = vmatmul.mubr.bf16.vlgmr.msra.gmra.mrb[4].mxu0 %v519_v55 }
 0x197   : > { %1312 = vmatprep.mubr.bf16.mxu0 %v626_v50 }
 0x1b1   : > { %v726_v57 = vpop.f32.mrb[8].mxu1 }
 0x1b2   : > { %v1290_v58 = vpop.f32.mrb[9].mxu1 }
 0x1b3   : > { %v729_v59 = vpop.f32.mrb[10].mxu1 }
 0x1b4   : > { %v733_v60 = vpack.c.bf16 %v729_v59, %v726_v57  ;;  %v1291_v61 = vpop.f32.mrb[11].mxu1 }
 0x1b6   : > { %1313 = vmatmul.mubr.bf16.gmra.mrb[8].mxu0 %v733_v60 }
 0x269   : > { %v1310_v62 = vpop.f32.mrb[4].mxu0 }
 0x26a   : > { %v837_v63 = vpop.f32.mrb[5].mxu0 }
 0x26b   : > { %v1311_v0 = vpop.f32.mrb[6].mxu0 }
 0x26c   : > { %v1149_v1 = vpack.c.bf16 %v1311_v0, %v1310_v62  ;;  %v840_v2 = vpop.f32.mrb[7].mxu0 }
 0x26d   : > { %v1144_v3 = vpack.c.bf16 %v840_v2, %v837_v63 }
 0x26e   : > { %1161 = vst [vmem:[%s289_s20 + $0x8] sm:$0xff] %v1149_v1  }
 0x26f   : > { %1145 = vst [vmem:[%s289_s20] sm:$0xff] %v1144_v3  }
 0x289   : > { %v1314_v4 = vpop.f32.mrb[8].mxu0 }
 0x28a   : > { %v853_v5 = vpop.f32.mrb[9].mxu0 }
 0x28b   : > { %v1315_v6 = vpop.f32.mrb[10].mxu0 }
 0x28c   : > { %v1159_v7 = vpack.c.bf16 %v1315_v6, %v1314_v4  ;;  %v856_v8 = vpop.f32.mrb[11].mxu0 }
 0x28d   : > { %v1154_v9 = vpack.c.bf16 %v856_v8, %v853_v5 }
 0x28e   : > { %1163 = vst [vmem:[%s289_s20 + $0x18] sm:$0xff] %v1159_v7  }
 0x28f   : > { %1162 = vst [vmem:[%s289_s20 + $0x10] sm:$0xff] %v1154_v9  }
 0x290   : > { %1544 = shalt.err (!%p1541_p8)
}
 0x291   : > { %s1545_s7 = scalar_lea.hbm %s1934_s11, 512  ;;  %s1549_s6 = scalar_lea.hbm %s1986_s3, 1024 }
 0x292   : > { %p1546_p11 = scmp.ne.s32.totalorder %s1934_s11, %s1545_s7  ;;  %p1550_p6 = scmp.lt.u32.totalorder %s1934_s11, %s1986_s3 }
 0x293   : > { %p1551_p13 = scmp.lt.u32.totalorder %s1549_s6, %s1545_s7  ;;  %p1553_p5 = scmp.lt.u32.totalorder %s1545_s7, %s1934_s11 }
 0x294   : > { %p1547_p12 = pnand %p1546_p11, %p1747_p10 }
 0x295   : > { %p1552_p0 = por %p1551_p13, %p1550_p6 }
 0x296   : > { %p1548_p3 = pneg %p1547_p12 }
 0x297   : > { %p1554_p9 = por %p1553_p5, %p1552_p0 }
 0x299   : > { %p1555_p1 = pnand %p1554_p9, %p1548_p3 }
 0x29b   : > { %1558 = shalt.err (!%p1555_p1)
}
 0x29c   : > { %s1633_s9 = smov 64   ;;  %s1634_s10 = smov 4  }
 0x29d   : > { %1324 = dma.vmem_to_hbm [thread:$0]  (%p1747_p10), %s1929_s19, 512, %s1934_s11, %s909_s4, %s1633_s9, %s1633_s9, %s1634_s10  }
 0x29e PF: > { %s943_s18 = sand.u32 1, %s1601_s12   ;;  %p2009_p2 = scmp.ne.s32.totalorder %s1994_s21, 0 }
 0x29f   : > { %p2010_p7 = scmp.ge.s32.totalorder %s1621_s17, 2  ;;  %s944_s20 = scalar_lea.sflag [#allocation5], %s943_s18 }
 0x2a1   : > { %p1338_p4 = pnand %p2010_p7, %p2009_p2 }
 0x2a3   : > { %1596 = dma.done.wait (!%p1338_p4), %s944_s20, 512  }
 0x2a4   : > { %1598 = vsyncadd (!%p1338_p4), %s944_s20, 4294966784  ;;  %s22_s17 = sadd.s32 1, %s1621_s17   ;;  %s2011_s25 = sld [smem:[#allocation14_spill]] }
 0x2a5   : > { %p19_p8 = scmp.ge.s32.totalorder %s22_s17, 4   ;;  %s2012_s12 = smov %s1605_s13 }
 0x2a6   : > { %s2013_s13 = smov %s1609_s14  ;;  %s2014_s14 = smov %s1759_s29 }
 0x2a7   : > { %s2015_s15 = smov %s1617_s16  ;;  %21 = sbr.rel (!%p19_p8) target bundleno = 11 (0xb), region = 99 }
 0x2aa   : > { %s2016_s16 = smov %s2011_s25 }
 0x2ae   :  { %949 = vsyncpa [#allocation4], 1 }
 0x2af   :  { %951 = vsyncpa [#allocation4 + $0x1], 1 }
 0x2b0   :  { %952 = vsyncpa [#allocation7], 1 }
 0x2b1   :  { %954 = vsyncpa [#allocation7 + $0x1], 1 }
 0x2b2   :  { %955 = vsyncpa [#allocation5], 1 }
 0x2b3   :  { %957 = vsyncpa [#allocation5 + $0x1], 1 }

</bundles_post_ra>
